<compile_context>
chip_gen: v6e
topology: v6e:2x2x1
jax: 0.10.0
libtpu: 0.0.40
codegen_flags: <defaults>
</compile_context>

<pallas_src>
import jax
import jax.numpy as jnp
from jax.experimental import pallas as pl
from jax.experimental.pallas import tpu as pltpu


def _attention_kernel(x_ref, w1_ref, b1_ref, w2_ref, b2_ref, o_ref):
    # Linear 1: native-dtype operands straight to the MXU, f32 accumulation.
    h = jnp.dot(x_ref[...], w1_ref[...], preferred_element_type=jnp.float32)
    h = jnp.maximum(h + b1_ref[...], 0.0)                    # bias (f32) + ReLU on VPU

    # Linear 2: cast activations to the weight dtype (no-op for f32 weights) so
    # bf16 weights keep the bf16 MXU rate; no per-step weight casts.
    z = jnp.dot(h.astype(w2_ref.dtype), w2_ref[...],
                preferred_element_type=jnp.float32)
    z = z + b2_ref[...]

    # Numerically stable softmax over dim=1 (lane axis), f32 throughout.
    z = z - jnp.max(z, axis=-1, keepdims=True)                # XLU reduce
    e = jnp.exp(z)                                            # EUP
    denom = jnp.sum(e, axis=-1, keepdims=True)                # XLU reduce
    inv = pl.reciprocal(denom, approx=False)                  # exact: row sums stay ~1
    o_ref[...] = (e * inv).astype(o_ref.dtype)


def _vmem_budgets():
    """Generation-aware VMEM numbers (bytes): (soft tile budget, hard limit cap)."""
    phys = 64 * 1024 * 1024          # conservative fallback (v7x per-TC VMEM)
    try:
        info = pltpu.get_tpu_info()
        cap = getattr(info, "vmem_capacity_bytes", None)
        if cap:
            phys = int(cap)
    except Exception:
        pass
    limit_cap = (phys * 7) // 8      # never request more than HW can honor
    budget = phys // 3               # soft budget for tiles + intermediates
    return budget, limit_cap


def _vmem_footprint(tb, D, x_itemsize, w_itemsize):
    """Estimated resident VMEM: double-buffered I/O tiles, double-buffered
    weights (default pipelining), f32 biases, and in-kernel f32 intermediates
    (h, z, e + scratch ~= 4 * tb * D * 4)."""
    io_tiles = 2 * (2 * tb * D * x_itemsize)          # x + out, double-buffered
    weights = 2 * (2 * D * D * w_itemsize)            # w1 + w2, double-buffered
    biases = 2 * (2 * D * 4)                          # b1 + b2, f32
    f32_tmp = 4 * tb * D * 4
    return io_tiles + weights + biases + f32_tmp


def _pick_row_tile(B, D, x_itemsize, w_itemsize, budget_bytes, tb_max=4096):
    """Largest sublane-aligned row tile fitting the VMEM budget, with >= 2
    balanced grid steps when B >= 16 so v7x can shard across both TCs."""
    tb = min(tb_max, B)
    if B >= 16:
        half = -(-B // 2)                             # cdiv(B, 2)
        half = max(8, ((half + 7) // 8) * 8)          # round up to sublane multiple
        tb = min(tb, half)
    if tb < B:
        tb = max(8, (tb // 8) * 8)
    while tb > 8 and _vmem_footprint(tb, D, x_itemsize, w_itemsize) > budget_bytes:
        tb = max(8, ((tb // 2) // 8) * 8)
    return tb


def attention_mechanism_pallas(x, w1, b1, w2, b2, *, tb=None):
    """Fused Linear->ReLU->Linear->Softmax(dim=1).

    x:  (B, D)
    w1: (D, D)  stored as (in, out)  [= nn.Linear weight transposed]
    b1: (D,) or (1, D)
    w2: (D, D)  stored as (in, out)
    b2: (D,) or (1, D)
    """
    B, D = x.shape
    # Tiny biases: cast to f32 once here so the kernel does no per-step casts.
    b1 = b1.reshape(1, D).astype(jnp.float32)
    b2 = b2.reshape(1, D).astype(jnp.float32)

    x_isz = jnp.dtype(x.dtype).itemsize
    w_isz = jnp.dtype(w1.dtype).itemsize
    budget, limit_cap = _vmem_budgets()

    if tb is None:
        tb = _pick_row_tile(B, D, x_isz, w_isz, budget)
    else:
        tb = min(int(tb), B)
        if tb < B:
            tb = max(8, (tb // 8) * 8)      # enforce sublane alignment for user tb too

    grid = (pl.cdiv(B, tb),)

    # Always set the scoped-VMEM limit explicitly from the corrected footprint
    # (v5e default is only 16 MiB), clamped to what the generation can honor.
    fp = _vmem_footprint(tb, D, x_isz, w_isz)
    vmem_limit = int(min(max(fp + (2 << 20), 16 << 20), limit_cap))

    return pl.pallas_call(
        _attention_kernel,
        out_shape=jax.ShapeDtypeStruct((B, D), x.dtype),
        grid=grid,
        in_specs=[
            pl.BlockSpec((tb, D), lambda i: (i, 0)),   # x row tile
            pl.BlockSpec((D, D), lambda i: (0, 0)),    # w1 (VMEM-resident)
            pl.BlockSpec((1, D), lambda i: (0, 0)),    # b1 (f32)
            pl.BlockSpec((D, D), lambda i: (0, 0)),    # w2 (VMEM-resident)
            pl.BlockSpec((1, D), lambda i: (0, 0)),    # b2 (f32)
        ],
        out_specs=pl.BlockSpec((tb, D), lambda i: (i, 0)),
        compiler_params=pltpu.CompilerParams(
            dimension_semantics=("parallel",),
            vmem_limit_bytes=vmem_limit,
        ),
    )(x, w1, b1, w2, b2)


if __name__ == "__main__":
    key = jax.random.PRNGKey(0)
    B, D = 8, 128   # small, lane-aligned demo shapes (embed_dim = 128)

    kx, k1, kb1, k2, kb2 = jax.random.split(key, 5)
    x = jax.random.normal(kx, (B, D), dtype=jnp.float32)
    # Weights stored as (in, out): equivalent to nn.Linear's W^T.
    w1 = jax.random.normal(k1, (D, D), dtype=jnp.float32) / jnp.sqrt(D)
    b1 = 0.01 * jax.random.normal(kb1, (D,), dtype=jnp.float32)
    w2 = jax.random.normal(k2, (D, D), dtype=jnp.float32) / jnp.sqrt(D)
    b2 = 0.01 * jax.random.normal(kb2, (D,), dtype=jnp.float32)

    # f32 path
    out = jax.block_until_ready(attention_mechanism_pallas(x, w1, b1, w2, b2))
    hp = jax.lax.Precision.HIGHEST
    h_ref = jax.nn.relu(jnp.dot(x, w1, precision=hp) + b1)
    ref = jax.nn.softmax(jnp.dot(h_ref, w2, precision=hp) + b2, axis=1)
    assert out.shape == (B, D) and out.dtype == x.dtype
    assert jnp.allclose(out, ref, atol=1e-4, rtol=1e-4), float(jnp.max(jnp.abs(out - ref)))
    assert jnp.allclose(jnp.sum(out, axis=1), 1.0, atol=1e-5)

    # bf16 fast path (bf16 x bf16 -> f32 accumulate on the MXU, no in-kernel upcasts)
    xb = x.astype(jnp.bfloat16)
    w1b = w1.astype(jnp.bfloat16)
    w2b = w2.astype(jnp.bfloat16)
    out_bf = jax.block_until_ready(attention_mechanism_pallas(xb, w1b, b1, w2b, b2))
    h_bf = jax.nn.relu(jnp.dot(xb, w1b, preferred_element_type=jnp.float32) + b1)
    z_bf = jnp.dot(h_bf.astype(jnp.bfloat16), w2b, preferred_element_type=jnp.float32) + b2
    ref_bf = jax.nn.softmax(z_bf, axis=1)
    assert out_bf.shape == (B, D) and out_bf.dtype == jnp.bfloat16
    assert jnp.allclose(out_bf.astype(jnp.float32), ref_bf, atol=2e-2)
    assert jnp.allclose(jnp.sum(out_bf.astype(jnp.float32), axis=1), 1.0, atol=3e-2)

    print("KERNEL_OK")
</pallas_src>

<mosaic_0001>
module attributes {stable_mosaic.version = 11 : i64} {
  func.func @_attention_kernel(%arg0: i32, %arg1: memref<8x128xf32, #tpu.memory_space<vmem>>, %arg2: memref<128x128xf32, #tpu.memory_space<vmem>>, %arg3: memref<1x128xf32, #tpu.memory_space<vmem>>, %arg4: memref<128x128xf32, #tpu.memory_space<vmem>>, %arg5: memref<1x128xf32, #tpu.memory_space<vmem>>, %arg6: memref<8x128xf32, #tpu.memory_space<vmem>>) attributes {dimension_semantics = [#tpu.dimension_semantics<parallel>], iteration_bounds = array<i64: 1>, scalar_prefetch = 0 : i64, scratch_operands = 0 : i64, tpu.core_type = #tpu.core_type<tc>, window_params = [{transform_indices = @transform_0, window_bounds = array<i64: 8, 128>}, {pipeline_mode = #tpu.pipeline_mode<synchronous>, transform_indices = @transform_1, window_bounds = array<i64: 128, 128>}, {pipeline_mode = #tpu.pipeline_mode<synchronous>, transform_indices = @transform_2, window_bounds = array<i64: 1, 128>}, {pipeline_mode = #tpu.pipeline_mode<synchronous>, transform_indices = @transform_3, window_bounds = array<i64: 128, 128>}, {pipeline_mode = #tpu.pipeline_mode<synchronous>, transform_indices = @transform_4, window_bounds = array<i64: 1, 128>}, {transform_indices = @transform_5, window_bounds = array<i64: 8, 128>}]} {
    %c0 = arith.constant 0 : index
    %c0_0 = arith.constant 0 : index
    %0 = vector.load %arg1[%c0, %c0_0] : memref<8x128xf32, #tpu.memory_space<vmem>>, vector<8x128xf32>
    %c0_1 = arith.constant 0 : index
    %c0_2 = arith.constant 0 : index
    %1 = vector.load %arg2[%c0_1, %c0_2] : memref<128x128xf32, #tpu.memory_space<vmem>>, vector<128x128xf32>
    %cst = arith.constant dense<0.000000e+00> : vector<8x128xf32>
    %2 = tpu.matmul %0, %1, %cst {dimension_numbers = #tpu.dot_dimension_numbers<[1], [0], [0], [1], [0, 0, 1, 1], [], []>} : vector<8x128xf32>, vector<128x128xf32>, vector<8x128xf32> -> vector<8x128xf32>
    %c0_3 = arith.constant 0 : index
    %c0_4 = arith.constant 0 : index
    %3 = vector.load %arg3[%c0_3, %c0_4] : memref<1x128xf32, #tpu.memory_space<vmem>>, vector<1x128xf32>
    %4 = vector.broadcast %3 : vector<1x128xf32> to vector<8x128xf32>
    %5 = arith.addf %2, %4 : vector<8x128xf32>
    %cst_5 = arith.constant 0.000000e+00 : f32
    %6 = vector.broadcast %cst_5 : f32 to vector<8x128xf32>
    %7 = arith.maximumf %5, %6 : vector<8x128xf32>
    %c0_6 = arith.constant 0 : index
    %c0_7 = arith.constant 0 : index
    %8 = vector.load %arg4[%c0_6, %c0_7] : memref<128x128xf32, #tpu.memory_space<vmem>>, vector<128x128xf32>
    %cst_8 = arith.constant dense<0.000000e+00> : vector<8x128xf32>
    %9 = tpu.matmul %7, %8, %cst_8 {dimension_numbers = #tpu.dot_dimension_numbers<[1], [0], [0], [1], [0, 0, 1, 1], [], []>} : vector<8x128xf32>, vector<128x128xf32>, vector<8x128xf32> -> vector<8x128xf32>
    %c0_9 = arith.constant 0 : index
    %c0_10 = arith.constant 0 : index
    %10 = vector.load %arg5[%c0_9, %c0_10] : memref<1x128xf32, #tpu.memory_space<vmem>>, vector<1x128xf32>
    %11 = vector.broadcast %10 : vector<1x128xf32> to vector<8x128xf32>
    %12 = arith.addf %9, %11 : vector<8x128xf32>
    %cst_11 = arith.constant dense<0xFF800000> : vector<8xf32>
    %13 = vector.multi_reduction <maximumf>, %12, %cst_11 [1] : vector<8x128xf32> to vector<8xf32>
    %14 = vector.shape_cast %13 : vector<8xf32> to vector<8x1xf32>
    %15 = vector.broadcast %14 : vector<8x1xf32> to vector<8x128xf32>
    %16 = arith.subf %12, %15 : vector<8x128xf32>
    %17 = math.exp %16 : vector<8x128xf32>
    %cst_12 = arith.constant dense<0.000000e+00> : vector<8xf32>
    %18 = vector.multi_reduction <add>, %17, %cst_12 [1] : vector<8x128xf32> to vector<8xf32>
    %19 = vector.shape_cast %18 : vector<8xf32> to vector<8x1xf32>
    %20 = tpu.reciprocal %19 : vector<8x1xf32> -> vector<8x1xf32>
    %21 = vector.broadcast %20 : vector<8x1xf32> to vector<8x128xf32>
    %22 = arith.mulf %17, %21 : vector<8x128xf32>
    %c0_13 = arith.constant 0 : index
    %c0_14 = arith.constant 0 : index
    %23 = vector.load %arg6[%c0_13, %c0_14] : memref<8x128xf32, #tpu.memory_space<vmem>>, vector<8x128xf32>
    tpu.vector_store %arg6[%c0_13, %c0_14], %22 {strides = array<i32>} : memref<8x128xf32, #tpu.memory_space<vmem>>, vector<8x128xf32>,
    return
  }
  func.func @transform_0(%arg0: i32) -> (i32, i32) {
    %c0_i32 = arith.constant 0 : i32
    %c0_i32_0 = arith.constant 0 : i32
    return %arg0, %c0_i32 : i32, i32
  }
  func.func @transform_1(%arg0: i32) -> (i32, i32) {
    %c0_i32 = arith.constant 0 : i32
    %c0_i32_0 = arith.constant 0 : i32
    %c0_i32_1 = arith.constant 0 : i32
    return %c0_i32, %c0_i32_0 : i32, i32
  }
  func.func @transform_2(%arg0: i32) -> (i32, i32) {
    %c0_i32 = arith.constant 0 : i32
    %c0_i32_0 = arith.constant 0 : i32
    %c0_i32_1 = arith.constant 0 : i32
    return %c0_i32, %c0_i32_0 : i32, i32
  }
  func.func @transform_3(%arg0: i32) -> (i32, i32) {
    %c0_i32 = arith.constant 0 : i32
    %c0_i32_0 = arith.constant 0 : i32
    %c0_i32_1 = arith.constant 0 : i32
    return %c0_i32, %c0_i32_0 : i32, i32
  }
  func.func @transform_4(%arg0: i32) -> (i32, i32) {
    %c0_i32 = arith.constant 0 : i32
    %c0_i32_0 = arith.constant 0 : i32
    %c0_i32_1 = arith.constant 0 : i32
    return %c0_i32, %c0_i32_0 : i32, i32
  }
  func.func @transform_5(%arg0: i32) -> (i32, i32) {
    %c0_i32 = arith.constant 0 : i32
    %c0_i32_0 = arith.constant 0 : i32
    return %arg0, %c0_i32 : i32, i32
  }
}

</mosaic_0001>

<bundles_post_ra>
// kernel: tpu_custom_call.1
= control target key start
LH: loop header
LB: loop body
LE: loop exit
PB: predicated region body
PF: predicated region fallthrough
CT: control target
= control target key end

     0   :  { %10 = vsyncpa [#allocation3], 0  ;;  %s568_s0 = inlined_call_operand.hbm [shape: f32[8,128], index: 0, kind: input, shape index: {}]   ;;  %s569_s1 = inlined_call_operand.hbm [shape: f32[128,128], index: 1, kind: input, shape index: {}]   ;;  %s570_s2 = inlined_call_operand.vmem [shape: f32[1,128], index: 2, kind: input, shape index: {}]   ;;  %s571_s3 = inlined_call_operand.hbm [shape: f32[128,128], index: 3, kind: input, shape index: {}]   ;;  %s572_s4 = inlined_call_operand.vmem [shape: f32[1,128], index: 4, kind: input, shape index: {}]   ;;  %s573_s5 = inlined_call_operand.hbm [shape: f32[8,128], index: 5, kind: output, shape index: {}]  }
   0x1   :  { %11 = vsyncpa [#allocation6], 0 }
   0x2   :  { %12 = vsyncpa [#allocation4], 0  ;;  %s478_s18 = smov [#allocation5]  }
   0x3   :  { %s28_s19 = sshll.u32 %s478_s18, 4  ;;  %s29_s19 = int_to_ptr.vmem [resolvable:$true] %s28_s19 }
   0x4   :  { %s400_s20 = scalar_lea.vmem %s29_s19, 2048  ;;  %p405_p1 = scmp.lt.s32.totalorder %s29_s19, %s29_s19 }
   0x5   :  { %p401_p0 = scmp.ne.s32.totalorder %s29_s19, %s400_s20  ;;  %p406_p2 = scmp.lt.s32.totalorder %s400_s20, %s400_s20 }
   0x7   :  { %p407_p3 = por %p406_p2, %p405_p1 }
   0x9   :  { %p408_p4 = pnand %p407_p3, %p401_p0 }
   0xb   :  { %411 = shalt.err (!%p408_p4)
}
   0xc   :  { %s479_s21 = smov 128   ;;  %s480_s22 = smov 8  }
   0xd   :  { %34 = dma.hbm_to_vmem [thread:$0]  %s569_s1, 2048, %s29_s19, [#allocation6], %s479_s21, %s479_s21, %s480_s22  }
   0xe   :  { %s481_s25 = smov [#allocation2]   ;;  %s482_s27 = smov [#allocation7]  }
   0xf   :  { %s19_s26 = sshll.u32 %s481_s25, 4  ;;  %s42_s28 = sshll.u32 %s482_s27, 4  ;;  %s20_s26 = int_to_ptr.vmem [resolvable:$true] %s19_s26  ;;  %s43_s28 = int_to_ptr.vmem [resolvable:$true] %s42_s28 }
  0x10   :  { %s420_s29 = scalar_lea.vmem %s20_s26, 128  ;;  %p425_p6 = scmp.lt.s32.totalorder %s20_s26, %s20_s26 }
  0x11   :  { %p421_p5 = scmp.ne.s32.totalorder %s20_s26, %s420_s29  ;;  %p426_p7 = scmp.lt.s32.totalorder %s420_s29, %s420_s29 }
  0x13   :  { %p427_p8 = por %p426_p7, %p425_p6 }
  0x15   :  { %p428_p9 = pnand %p427_p8, %p421_p5 }
  0x17   :  { %431 = shalt.err (!%p428_p9)
}
  0x18   :  { %22 = dma.hbm_to_vmem [thread:$0]  %s568_s0, 128, %s20_s26, [#allocation3]  }
  0x19   :  { %s440_s7 = scalar_lea.vmem %s43_s28, 2048  ;;  %p445_p11 = scmp.lt.s32.totalorder %s43_s28, %s43_s28 }
  0x1a   :  { %p441_p10 = scmp.ne.s32.totalorder %s43_s28, %s440_s7  ;;  %p446_p12 = scmp.lt.s32.totalorder %s440_s7, %s440_s7 }
  0x1c   :  { %p447_p13 = por %p446_p12, %p445_p11 }
  0x1e   :  { %p448_p0 = pnand %p447_p13, %p441_p10 }
  0x20   :  { %451 = shalt.err (!%p448_p0)
}
  0x21   :  { %48 = dma.hbm_to_vmem [thread:$0]  %s571_s3, 2048, %s43_s28, [#allocation6], %s479_s21, %s479_s21, %s480_s22  }
  0x22   :  { %472 = dma.done.wait [#allocation3], 128  }
  0x23   :  { %473 = vsyncadd [#allocation3], 4294967168 }
  0x24   :  { %474 = dma.done.wait [#allocation6], 4096  }
  0x25   :  { %475 = vsyncadd [#allocation6], 4294963200  ;;  %v483_v0 = vmov 0.0   ;;  %vm484_vm0 = vmmov 0   ;;  %v76_v1 = vld [vmem:[#allocation5 + $0x78] sm:$0xff]  ;;  %v75_v2 = vld [vmem:[#allocation5 + $0x70] sm:$0xff] }
  0x26   :  { %310 = vmatprep.subr.mxu0 %v483_v0  ;;  %342 = vmatprep.mubr.msk.f32.mxu0 %vm484_vm0, %v483_v0  ;;  %v74_v3 = vld [vmem:[#allocation5 + $0x68] sm:$0xff]  ;;  %v73_v4 = vld [vmem:[#allocation5 + $0x60] sm:$0xff]  ;;  %v170_v5 = vld [vmem:[#allocation7 + $0x78] sm:$0xff] }
  0x27   :  { %345 = vmatprep.subr.mxu1 %v483_v0  ;;  %377 = vmatprep.mubr.msk.f32.mxu1 %vm484_vm0, %v483_v0  ;;  %v72_v6 = vld [vmem:[#allocation5 + $0x58] sm:$0xff]  ;;  %v169_v7 = vld [vmem:[#allocation7 + $0x70] sm:$0xff]  ;;  %v168_v8 = vld [vmem:[#allocation7 + $0x68] sm:$0xff] }
  0x28   :  { %311 = vmatpush3.msra.mxu0 %v76_v1  ;;  %346 = vmatpush3.msra.mxu1 %v170_v5  ;;  %v71_v9 = vld [vmem:[#allocation5 + $0x50] sm:$0xff]  ;;  %v167_v10 = vld [vmem:[#allocation7 + $0x60] sm:$0xff]  ;;  %v70_v11 = vld [vmem:[#allocation5 + $0x48] sm:$0xff] }
  0x29   :  { %312 = vmatprep.subr.mxu0 %v483_v0  ;;  %347 = vmatprep.subr.mxu1 %v483_v0  ;;  %v166_v12 = vld [vmem:[#allocation7 + $0x58] sm:$0xff]  ;;  %v69_v13 = vld [vmem:[#allocation5 + $0x40] sm:$0xff]  ;;  %v165_v14 = vld [vmem:[#allocation7 + $0x50] sm:$0xff] }
  0x2a   :  { %313 = vmatpush3.msra.mxu0 %v75_v2  ;;  %348 = vmatpush3.msra.mxu1 %v169_v7  ;;  %v68_v15 = vld [vmem:[#allocation5 + $0x38] sm:$0xff]  ;;  %v164_v16 = vld [vmem:[#allocation7 + $0x48] sm:$0xff]  ;;  %v67_v17 = vld [vmem:[#allocation5 + $0x30] sm:$0xff] }
  0x2b   :  { %314 = vmatprep.subr.mxu0 %v483_v0  ;;  %349 = vmatprep.subr.mxu1 %v483_v0  ;;  %v163_v18 = vld [vmem:[#allocation7 + $0x40] sm:$0xff]  ;;  %v66_v19 = vld [vmem:[#allocation5 + $0x28] sm:$0xff]  ;;  %v162_v20 = vld [vmem:[#allocation7 + $0x38] sm:$0xff] }
  0x2c   :  { %315 = vmatpush3.msra.mxu0 %v74_v3  ;;  %350 = vmatpush3.msra.mxu1 %v168_v8  ;;  %v65_v21 = vld [vmem:[#allocation5 + $0x20] sm:$0xff]  ;;  %v161_v22 = vld [vmem:[#allocation7 + $0x30] sm:$0xff]  ;;  %v64_v23 = vld [vmem:[#allocation5 + $0x18] sm:$0xff] }
  0x2d   :  { %316 = vmatprep.subr.mxu0 %v483_v0  ;;  %351 = vmatprep.subr.mxu1 %v483_v0  ;;  %v160_v24 = vld [vmem:[#allocation7 + $0x28] sm:$0xff]  ;;  %v63_v25 = vld [vmem:[#allocation5 + $0x10] sm:$0xff]  ;;  %v159_v26 = vld [vmem:[#allocation7 + $0x20] sm:$0xff] }
  0x2e   :  { %317 = vmatpush3.msra.mxu0 %v73_v4  ;;  %352 = vmatpush3.msra.mxu1 %v167_v10  ;;  %v62_v27 = vld [vmem:[#allocation5 + $0x8] sm:$0xff]  ;;  %v158_v28 = vld [vmem:[#allocation7 + $0x18] sm:$0xff]  ;;  %v61_v29 = vld [vmem:[#allocation5] sm:$0xff] }
  0x2f   :  { %318 = vmatprep.subr.mxu0 %v483_v0  ;;  %353 = vmatprep.subr.mxu1 %v483_v0  ;;  %v60_v30 = vld [vmem:[#allocation2] sm:$0xff]  ;;  %v157_v31 = vld [vmem:[#allocation7 + $0x10] sm:$0xff]  ;;  %v156_v32 = vld [vmem:[#allocation7 + $0x8] sm:$0xff] }
  0x30   :  { %319 = vmatpush3.msra.mxu0 %v72_v6  ;;  %354 = vmatpush3.msra.mxu1 %v166_v12  ;;  %v155_v33 = vld [vmem:[#allocation7] sm:$0xff]  ;;  %v274_v34 = vld [vmem:[%s570_s2] ss:$0 sm:$0xff]  ;;  %s485_s2 = smov [#allocation8]  }
  0x31   :  { %320 = vmatprep.subr.mxu0 %v483_v0  ;;  %355 = vmatprep.subr.mxu1 %v483_v0  ;;  %v275_v39 = vld [vmem:[%s572_s4] ss:$0 sm:$0xff]  ;;  %s264_s11 = sshll.u32 %s485_s2, 4  ;;  %s265_s11 = int_to_ptr.vmem [resolvable:$true] %s264_s11 }
  0x32   :  { %321 = vmatpush3.msra.mxu0 %v71_v9  ;;  %356 = vmatpush3.msra.mxu1 %v165_v14  ;;  %s452_s12 = scalar_lea.vmem %s265_s11, 128  ;;  %p457_p2 = scmp.lt.s32.totalorder %s265_s11, %s265_s11 }
  0x33   :  { %322 = vmatprep.subr.mxu0 %v483_v0  ;;  %357 = vmatprep.subr.mxu1 %v483_v0  ;;  %p453_p1 = scmp.ne.s32.totalorder %s265_s11, %s452_s12  ;;  %p458_p3 = scmp.lt.s32.totalorder %s452_s12, %s452_s12 }
  0x34   :  { %323 = vmatpush3.msra.mxu0 %v70_v11  ;;  %358 = vmatpush3.msra.mxu1 %v164_v16 }
  0x35   :  { %324 = vmatprep.subr.mxu0 %v483_v0  ;;  %359 = vmatprep.subr.mxu1 %v483_v0  ;;  %p459_p4 = por %p458_p3, %p457_p2 }
  0x36   :  { %325 = vmatpush3.msra.mxu0 %v69_v13  ;;  %360 = vmatpush3.msra.mxu1 %v163_v18 }
  0x37   :  { %326 = vmatprep.subr.mxu0 %v483_v0  ;;  %361 = vmatprep.subr.mxu1 %v483_v0  ;;  %p460_p5 = pnand %p459_p4, %p453_p1 }
  0x38   :  { %327 = vmatpush3.msra.mxu0 %v68_v15  ;;  %362 = vmatpush3.msra.mxu1 %v162_v20 }
  0x39   :  { %328 = vmatprep.subr.mxu0 %v483_v0  ;;  %363 = vmatprep.subr.mxu1 %v483_v0 }
  0x3a   :  { %329 = vmatpush3.msra.mxu0 %v67_v17  ;;  %364 = vmatpush3.msra.mxu1 %v161_v22 }
  0x3b   :  { %330 = vmatprep.subr.mxu0 %v483_v0  ;;  %365 = vmatprep.subr.mxu1 %v483_v0 }
  0x3c   :  { %331 = vmatpush3.msra.mxu0 %v66_v19  ;;  %366 = vmatpush3.msra.mxu1 %v160_v24 }
  0x3d   :  { %332 = vmatprep.subr.mxu0 %v483_v0  ;;  %367 = vmatprep.subr.mxu1 %v483_v0 }
  0x3e   :  { %333 = vmatpush3.msra.mxu0 %v65_v21  ;;  %368 = vmatpush3.msra.mxu1 %v159_v26 }
  0x3f   :  { %334 = vmatprep.subr.mxu0 %v483_v0  ;;  %369 = vmatprep.subr.mxu1 %v483_v0 }
  0x40   :  { %335 = vmatpush3.msra.mxu0 %v64_v23  ;;  %370 = vmatpush3.msra.mxu1 %v158_v28 }
  0x41   :  { %336 = vmatprep.subr.mxu0 %v483_v0  ;;  %371 = vmatprep.subr.mxu1 %v483_v0 }
  0x42   :  { %337 = vmatpush3.msra.mxu0 %v63_v25  ;;  %372 = vmatpush3.msra.mxu1 %v157_v31 }
  0x43   :  { %338 = vmatprep.subr.mxu0 %v483_v0  ;;  %373 = vmatprep.subr.mxu1 %v483_v0 }
  0x44   :  { %339 = vmatpush3.msra.mxu0 %v62_v27  ;;  %374 = vmatpush3.msra.mxu1 %v156_v32 }
  0x45   :  { %340 = vmatprep.subr.mxu0 %v483_v0  ;;  %375 = vmatprep.subr.mxu1 %v483_v0 }
  0x46   :  { %341 = vmatpush3.msra.mxu0 %v61_v29  ;;  %376 = vmatpush3.msra.mxu1 %v155_v33 }
  0x47   :  { %343 = vmatmul.mubr.f32.vlgmr.msra.gmra.mxu0 %v60_v30 }
 0x107   :  { %v150_v35 = vpop.f32.mrf.mxu0 }
 0x108   :  { %v151_v36 = vadd.f32 %v274_v34, %v150_v35 }
 0x109   :  { %v344_v37 = vpop.f32.mrf.mxu0 }
 0x10a   :  { %v154_v38 = vmax.f32 %v151_v36, 0.0 }
 0x10c   :  { %378 = vmatmul.mubr.f32.vlgmr.msra.gmra.mxu1 %v154_v38 }
 0x1cc   :  { %v244_v40 = vpop.f32.mrf.mxu1 }
 0x1cd   :  { %v245_v41 = vadd.f32 %v275_v39, %v244_v40 }
 0x1ce   :  { %v379_v42 = vpop.f32.mrf.mxu1 }
 0x1cf   :  { %248 = vmax.xlane.f32.xlu0 %v245_v41 }
 0x258   :  { %v249_v43 = vpop.xlane.xlu0 %248 }
 0x259   :  { %v250_v44 = vsub.f32 %v245_v41, %v249_v43 }
 0x25b   :  { %v251_v45 = vmul.f32 1.442695, %v250_v44 }
 0x25d   :  { %388 = vpow2.f32 %v251_v45 }
 0x26a   :  { %v389_v46 = vpop.eup %388 }
 0x26b   :  { %253 = vadd.xlane.f32.xlu0 %v389_v46 }
 0x2f4   :  { %v254_v47 = vpop.xlane.xlu0 %253 }
 0x2f5   :  { %390 = vrcp.f32 %v254_v47 }
 0x302   :  { %v391_v48 = vpop.eup %390 }
 0x303   :  { %v256_v49 = vmul.f32 %v391_v48, %v389_v46 }
 0x305   :  { %257 = vst [vmem:[#allocation8] sm:$0xff] %v256_v49 }
 0x306   :  { %463 = shalt.err (!%p460_p5)
}
 0x307   :  { %267 = dma.vmem_to_hbm [thread:$0]  %s265_s11, 128, %s573_s5, [#allocation4]  }
 0x308   :  { %476 = dma.done.wait [#allocation4], 128  }
 0x309   :  { %477 = vsyncadd [#allocation4], 4294967168 }
 0x30a   :  { %271 = vsyncpa [#allocation3], 1 }
 0x30b   :  { %272 = vsyncpa [#allocation6], 1 }
 0x30c   :  { %273 = vsyncpa [#allocation4], 1 }

</bundles_post_ra>
